<compile_context>
chip_gen: v5e
topology: v5e:2x2
jax: 0.10.0
libtpu: 0.0.40
codegen_flags: <defaults>
</compile_context>

<pallas_src>
import jax
import jax.numpy as jnp
from jax.experimental import pallas as pl
from jax.experimental.pallas import tpu as pltpu


INPUT_SIZE = 24 * 3        # 72
HIDDEN_SIZE = 72
HIDDEN3 = 3 * HIDDEN_SIZE  # 216
OUTPUT_SIZE = 4
LEAKY_SLOPE = 0.01         # PyTorch nn.LeakyReLU default negative_slope

# Lane-padded (multiples of 128) dims used for the weights inside the kernel.
HID_PAD = 128              # hidden 72 -> 128
HID3_PAD = 256             # 3*hidden 216 -> 256
OUT_PAD = 128              # output 4 -> 128 (compute width; store is 4-wide)

MAX_BATCH_TILE = 2048

# TODO(synk): the joblib scaler load / scaler.transform preprocessing in
# predict.py is host-side sklearn code, not part of the nn.Module forward.


def _round_up(n, m):
    return ((n + m - 1) // m) * m


def _pad2(a, rows, cols):
    """Zero-pad a 2-D array up to (rows, cols)."""
    out = jnp.zeros((rows, cols), a.dtype)
    return out.at[: a.shape[0], : a.shape[1]].set(a)


def pack_params(params, compute_dtype=jnp.bfloat16):
    """One-time weight/bias packing: zero lane-padding + bf16 cast for weights,
    f32 biases.  Do this once, outside the per-step call path."""
    w1, b1, w2, b2, w3, b3 = params
    w1p = _pad2(jnp.asarray(w1), INPUT_SIZE, HID_PAD).astype(compute_dtype)   # (72, 128)
    w2p = _pad2(jnp.asarray(w2), HID_PAD, HID3_PAD).astype(compute_dtype)     # (128, 256)
    w3p = _pad2(jnp.asarray(w3), HID3_PAD, OUT_PAD).astype(compute_dtype)     # (256, 128)
    b1p = _pad2(jnp.asarray(b1).reshape(1, -1), 1, HID_PAD).astype(jnp.float32)
    b2p = _pad2(jnp.asarray(b2).reshape(1, -1), 1, HID3_PAD).astype(jnp.float32)
    b3p = _pad2(jnp.asarray(b3).reshape(1, -1), 1, OUT_PAD).astype(jnp.float32)
    return (w1p, b1p, w2p, b2p, w3p, b3p)


def mlp_kernel(x_ref, w1_ref, b1_ref, w2_ref, b2_ref, w3_ref, b3_ref, o_ref):
    """Fused 3-layer MLP on one (tb, 72) f32 batch tile.

    MXU inputs are bf16, accumulation/bias/activation math is f32.  Padded
    weight rows/cols are zero so padding is numerically exact; only the 4 real
    output columns are stored.
    """
    x = x_ref[...].astype(jnp.bfloat16)              # (tb, 72), cast on VPU (free)

    # Layer 1: Linear(72 -> 72) + LeakyReLU(0.01)
    h1 = jnp.dot(x, w1_ref[...], preferred_element_type=jnp.float32) + b1_ref[...]
    h1 = jnp.where(h1 > 0, h1, LEAKY_SLOPE * h1)     # (tb, 128) f32

    # Layer 2: Linear(72 -> 216) + ReLU
    h2 = jnp.dot(h1.astype(jnp.bfloat16), w2_ref[...],
                 preferred_element_type=jnp.float32) + b2_ref[...]
    h2 = jnp.maximum(h2, 0.0)                        # (tb, 256) f32

    # Layer 3: Linear(216 -> 4); compute 128-wide, store only the 4 real cols.
    out = jnp.dot(h2.astype(jnp.bfloat16), w3_ref[...],
                  preferred_element_type=jnp.float32) + b3_ref[...]
    o_ref[...] = out[:, :OUTPUT_SIZE].astype(o_ref.dtype)


def _fallback_forward(x, packed):
    """Plain-JAX small-batch path, same bf16-matmul / f32-accumulate recipe."""
    w1p, b1p, w2p, b2p, w3p, b3p = packed
    h1 = jnp.dot(x.astype(jnp.bfloat16), w1p, preferred_element_type=jnp.float32) + b1p
    h1 = jnp.where(h1 > 0, h1, LEAKY_SLOPE * h1)
    h2 = jnp.maximum(
        jnp.dot(h1.astype(jnp.bfloat16), w2p, preferred_element_type=jnp.float32) + b2p,
        0.0)
    out = jnp.dot(h2.astype(jnp.bfloat16), w3p, preferred_element_type=jnp.float32) + b3p
    return out[:, :OUTPUT_SIZE]


def _choose_batch_tile(B):
    b16 = _round_up(B, 16)
    tb = min(b16, MAX_BATCH_TILE)
    if b16 >= 32:
        # Ensure >= 2 grid steps so the ("parallel",) batch axis can shard
        # across both v7x TensorCores (harmless ~0.35us extra elsewhere).
        tb = min(tb, _round_up(pl.cdiv(b16, 2), 16))
    return max(tb, 16)


def mlp_forward(x, packed_params, *, batch_tile=None, min_kernel_batch=256):
    """Run the fused MLP. x: (B, 72) float32 -> (B, 4) float32.

    `packed_params` comes from pack_params(params) (done once)."""
    w1p, b1p, w2p, b2p, w3p, b3p = packed_params
    B, F = x.shape
    assert F == INPUT_SIZE

    if B < min_kernel_batch:
        return _fallback_forward(x, packed_params)

    # --- batch tiling ---------------------------------------------------------
    tb = _choose_batch_tile(B) if batch_tile is None else _round_up(batch_tile, 16)
    Bp = _round_up(B, tb)
    grid = (Bp // tb,)

    # Pad only the batch dim (rows B..Bp are zero; their bias-driven outputs
    # are sliced off below).
    xp = x if Bp == B else jnp.zeros((Bp, INPUT_SIZE), x.dtype).at[:B].set(x)

    full = lambda i: (0, 0)  # weights/biases: same full block every grid step

    flops = 2 * Bp * (INPUT_SIZE * HID_PAD + HID_PAD * HID3_PAD + HID3_PAD * OUT_PAD)
    bytes_accessed = (
        Bp * INPUT_SIZE * 4                       # x read
        + Bp * OUTPUT_SIZE * 4                    # out write
        + sum(a.size * a.dtype.itemsize for a in (w1p, w2p, w3p, b1p, b2p, b3p))
    )

    out = pl.pallas_call(
        mlp_kernel,
        out_shape=jax.ShapeDtypeStruct((Bp, OUTPUT_SIZE), jnp.float32),
        grid_spec=pltpu.PrefetchScalarGridSpec(
            num_scalar_prefetch=0,
            grid=grid,
            in_specs=[
                pl.BlockSpec((tb, INPUT_SIZE), lambda i: (i, 0)),   # x tile (72 = full dim)
                pl.BlockSpec((INPUT_SIZE, HID_PAD), full),          # W1 (72, 128)
                pl.BlockSpec((1, HID_PAD), full),                   # b1
                pl.BlockSpec((HID_PAD, HID3_PAD), full),            # W2 (128, 256)
                pl.BlockSpec((1, HID3_PAD), full),                  # b2
                pl.BlockSpec((HID3_PAD, OUT_PAD), full),            # W3 (256, 128)
                pl.BlockSpec((1, OUT_PAD), full),                   # b3
            ],
            out_specs=pl.BlockSpec((tb, OUTPUT_SIZE), lambda i: (i, 0)),
        ),
        compiler_params=pltpu.CompilerParams(
            dimension_semantics=("parallel",),
            vmem_limit_bytes=32 << 20,
        ),
        cost_estimate=pl.CostEstimate(
            flops=flops, transcendentals=0, bytes_accessed=bytes_accessed),
    )(xp, w1p, b1p, w2p, b2p, w3p, b3p)

    return out[:B] if Bp != B else out


def init_params(key):
    """Parameter init matching nn.Linear defaults:
    uniform(-1/sqrt(fan_in), 1/sqrt(fan_in)) for both weight and bias."""
    ks = jax.random.split(key, 6)

    def linear(kw, kb, fan_in, fan_out):
        bound = 1.0 / jnp.sqrt(fan_in)
        w = jax.random.uniform(kw, (fan_in, fan_out), jnp.float32, -bound, bound)
        b = jax.random.uniform(kb, (1, fan_out), jnp.float32, -bound, bound)
        return w, b

    w1, b1 = linear(ks[0], ks[1], INPUT_SIZE, HIDDEN_SIZE)
    w2, b2 = linear(ks[2], ks[3], HIDDEN_SIZE, HIDDEN3)
    w3, b3 = linear(ks[4], ks[5], HIDDEN3, OUTPUT_SIZE)
    return (w1, b1, w2, b2, w3, b3)


def reference_forward(x, params, compute_dtype=jnp.bfloat16):
    """Plain-JAX reference with the same bf16-in / f32-accumulate matmul recipe
    as the kernel (intentional accuracy tradeoff vs pure-f32 PyTorch)."""
    w1, b1, w2, b2, w3, b3 = params

    def lin(a, w, b):
        return jnp.dot(a.astype(compute_dtype), w.astype(compute_dtype),
                       preferred_element_type=jnp.float32) + b

    h1 = lin(x, w1, b1)
    h1 = jnp.where(h1 > 0, h1, LEAKY_SLOPE * h1)
    h2 = jnp.maximum(lin(h1, w2, b2), 0.0)
    return lin(h2, w3, b3)


if __name__ == "__main__":
    key = jax.random.PRNGKey(0)
    k_x, k_p = jax.random.split(key)

    # Small batch, non-multiple of the tile so padding + 2-step grid is exercised.
    B = 50
    x = jax.random.normal(k_x, (B, INPUT_SIZE), dtype=jnp.float32)
    params = init_params(k_p)
    packed = pack_params(params)          # one-time packing (hoisted out of call path)

    # Force the Pallas kernel path even at this small batch.
    out = jax.block_until_ready(mlp_forward(x, packed, min_kernel_batch=0))

    ref = reference_forward(x, params)
    assert out.shape == (B, OUTPUT_SIZE)
    assert jnp.allclose(out, ref, atol=5e-3, rtol=5e-3), "kernel mismatch vs reference"

    # Also sanity-check the small-batch fallback path.
    fb = jax.block_until_ready(mlp_forward(x, packed))   # B < 256 -> plain JAX
    assert jnp.allclose(fb, ref, atol=5e-3, rtol=5e-3), "fallback mismatch vs reference"

    print("KERNEL_OK")
</pallas_src>

<mosaic_0001>
module attributes {stable_mosaic.version = 11 : i64} {
  func.func @mlp_kernel(%arg0: i32, %arg1: memref<32x72xf32, #tpu.memory_space<vmem>>, %arg2: memref<72x128xbf16, #tpu.memory_space<vmem>>, %arg3: memref<1x128xf32, #tpu.memory_space<vmem>>, %arg4: memref<128x256xbf16, #tpu.memory_space<vmem>>, %arg5: memref<1x256xf32, #tpu.memory_space<vmem>>, %arg6: memref<256x128xbf16, #tpu.memory_space<vmem>>, %arg7: memref<1x128xf32, #tpu.memory_space<vmem>>, %arg8: memref<32x4xf32, #tpu.memory_space<vmem>>) attributes {dimension_semantics = [#tpu.dimension_semantics<parallel>], iteration_bounds = array<i64: 2>, scalar_prefetch = 0 : i64, scratch_operands = 0 : i64, tpu.core_type = #tpu.core_type<tc>, window_params = [{transform_indices = @transform_0, window_bounds = array<i64: 32, 72>}, {pipeline_mode = #tpu.pipeline_mode<synchronous>, transform_indices = @transform_1, window_bounds = array<i64: 72, 128>}, {pipeline_mode = #tpu.pipeline_mode<synchronous>, transform_indices = @transform_2, window_bounds = array<i64: 1, 128>}, {pipeline_mode = #tpu.pipeline_mode<synchronous>, transform_indices = @transform_3, window_bounds = array<i64: 128, 256>}, {pipeline_mode = #tpu.pipeline_mode<synchronous>, transform_indices = @transform_4, window_bounds = array<i64: 1, 256>}, {pipeline_mode = #tpu.pipeline_mode<synchronous>, transform_indices = @transform_5, window_bounds = array<i64: 256, 128>}, {pipeline_mode = #tpu.pipeline_mode<synchronous>, transform_indices = @transform_6, window_bounds = array<i64: 1, 128>}, {transform_indices = @transform_7, window_bounds = array<i64: 32, 4>}]} {
    %c0 = arith.constant 0 : index
    %c0_0 = arith.constant 0 : index
    %0 = vector.load %arg1[%c0, %c0_0] : memref<32x72xf32, #tpu.memory_space<vmem>>, vector<32x72xf32>
    %1 = arith.truncf %0 : vector<32x72xf32> to vector<32x72xbf16>
    %c0_1 = arith.constant 0 : index
    %c0_2 = arith.constant 0 : index
    %2 = vector.load %arg2[%c0_1, %c0_2] : memref<72x128xbf16, #tpu.memory_space<vmem>>, vector<72x128xbf16>
    %cst = arith.constant dense<0.000000e+00> : vector<32x128xf32>
    %3 = tpu.matmul %1, %2, %cst {dimension_numbers = #tpu.dot_dimension_numbers<[1], [0], [0], [1], [0, 0, 1, 1], [], []>} : vector<32x72xbf16>, vector<72x128xbf16>, vector<32x128xf32> -> vector<32x128xf32>
    %c0_3 = arith.constant 0 : index
    %c0_4 = arith.constant 0 : index
    %4 = vector.load %arg3[%c0_3, %c0_4] : memref<1x128xf32, #tpu.memory_space<vmem>>, vector<1x128xf32>
    %5 = vector.broadcast %4 : vector<1x128xf32> to vector<32x128xf32>
    %6 = arith.addf %3, %5 : vector<32x128xf32>
    %cst_5 = arith.constant 0.000000e+00 : f32
    %7 = vector.broadcast %cst_5 : f32 to vector<32x128xf32>
    %8 = arith.cmpf ogt, %6, %7 : vector<32x128xf32>
    %cst_6 = arith.constant 0.00999999977 : f32
    %9 = vector.broadcast %cst_6 : f32 to vector<32x128xf32>
    %10 = arith.mulf %9, %6 : vector<32x128xf32>
    %11 = arith.select %8, %6, %10 : vector<32x128xi1>, vector<32x128xf32>
    %12 = arith.truncf %11 : vector<32x128xf32> to vector<32x128xbf16>
    %c0_7 = arith.constant 0 : index
    %c0_8 = arith.constant 0 : index
    %13 = vector.load %arg4[%c0_7, %c0_8] : memref<128x256xbf16, #tpu.memory_space<vmem>>, vector<128x256xbf16>
    %cst_9 = arith.constant dense<0.000000e+00> : vector<32x256xf32>
    %14 = tpu.matmul %12, %13, %cst_9 {dimension_numbers = #tpu.dot_dimension_numbers<[1], [0], [0], [1], [0, 0, 1, 1], [], []>} : vector<32x128xbf16>, vector<128x256xbf16>, vector<32x256xf32> -> vector<32x256xf32>
    %c0_10 = arith.constant 0 : index
    %c0_11 = arith.constant 0 : index
    %15 = vector.load %arg5[%c0_10, %c0_11] : memref<1x256xf32, #tpu.memory_space<vmem>>, vector<1x256xf32>
    %16 = vector.broadcast %15 : vector<1x256xf32> to vector<32x256xf32>
    %17 = arith.addf %14, %16 : vector<32x256xf32>
    %cst_12 = arith.constant 0.000000e+00 : f32
    %18 = vector.broadcast %cst_12 : f32 to vector<32x256xf32>
    %19 = arith.maximumf %17, %18 : vector<32x256xf32>
    %20 = arith.truncf %19 : vector<32x256xf32> to vector<32x256xbf16>
    %c0_13 = arith.constant 0 : index
    %c0_14 = arith.constant 0 : index
    %21 = vector.load %arg6[%c0_13, %c0_14] : memref<256x128xbf16, #tpu.memory_space<vmem>>, vector<256x128xbf16>
    %cst_15 = arith.constant dense<0.000000e+00> : vector<32x128xf32>
    %22 = tpu.matmul %20, %21, %cst_15 {dimension_numbers = #tpu.dot_dimension_numbers<[1], [0], [0], [1], [0, 0, 1, 1], [], []>} : vector<32x256xbf16>, vector<256x128xbf16>, vector<32x128xf32> -> vector<32x128xf32>
    %c0_16 = arith.constant 0 : index
    %c0_17 = arith.constant 0 : index
    %23 = vector.load %arg7[%c0_16, %c0_17] : memref<1x128xf32, #tpu.memory_space<vmem>>, vector<1x128xf32>
    %24 = vector.broadcast %23 : vector<1x128xf32> to vector<32x128xf32>
    %25 = arith.addf %22, %24 : vector<32x128xf32>
    %26 = vector.extract_strided_slice %25 {offsets = [0, 0], sizes = [32, 4], strides = [1, 1]} : vector<32x128xf32> to vector<32x4xf32>
    %c0_18 = arith.constant 0 : index
    %c0_19 = arith.constant 0 : index
    %27 = vector.load %arg8[%c0_18, %c0_19] : memref<32x4xf32, #tpu.memory_space<vmem>>, vector<32x4xf32>
    tpu.vector_store %arg8[%c0_18, %c0_19], %26 {strides = array<i32>} : memref<32x4xf32, #tpu.memory_space<vmem>>, vector<32x4xf32>,
    return
  }
  func.func @transform_0(%arg0: i32) -> (i32, i32) {
    %c0_i32 = arith.constant 0 : i32
    %c0_i32_0 = arith.constant 0 : i32
    return %arg0, %c0_i32 : i32, i32
  }
  func.func @transform_1(%arg0: i32) -> (i32, i32) {
    %c0_i32 = arith.constant 0 : i32
    %c0_i32_0 = arith.constant 0 : i32
    %c0_i32_1 = arith.constant 0 : i32
    return %c0_i32, %c0_i32_0 : i32, i32
  }
  func.func @transform_2(%arg0: i32) -> (i32, i32) {
    %c0_i32 = arith.constant 0 : i32
    %c0_i32_0 = arith.constant 0 : i32
    %c0_i32_1 = arith.constant 0 : i32
    return %c0_i32, %c0_i32_0 : i32, i32
  }
  func.func @transform_3(%arg0: i32) -> (i32, i32) {
    %c0_i32 = arith.constant 0 : i32
    %c0_i32_0 = arith.constant 0 : i32
    %c0_i32_1 = arith.constant 0 : i32
    return %c0_i32, %c0_i32_0 : i32, i32
  }
  func.func @transform_4(%arg0: i32) -> (i32, i32) {
    %c0_i32 = arith.constant 0 : i32
    %c0_i32_0 = arith.constant 0 : i32
    %c0_i32_1 = arith.constant 0 : i32
    return %c0_i32, %c0_i32_0 : i32, i32
  }
  func.func @transform_5(%arg0: i32) -> (i32, i32) {
    %c0_i32 = arith.constant 0 : i32
    %c0_i32_0 = arith.constant 0 : i32
    %c0_i32_1 = arith.constant 0 : i32
    return %c0_i32, %c0_i32_0 : i32, i32
  }
  func.func @transform_6(%arg0: i32) -> (i32, i32) {
    %c0_i32 = arith.constant 0 : i32
    %c0_i32_0 = arith.constant 0 : i32
    %c0_i32_1 = arith.constant 0 : i32
    return %c0_i32, %c0_i32_0 : i32, i32
  }
  func.func @transform_7(%arg0: i32) -> (i32, i32) {
    %c0_i32 = arith.constant 0 : i32
    %c0_i32_0 = arith.constant 0 : i32
    return %arg0, %c0_i32 : i32, i32
  }
}

</mosaic_0001>

<bundles_post_ra>
// kernel: tpu_custom_call.1
= control target key start
LH: loop header
LB: loop body
LE: loop exit
PB: predicated region body
PF: predicated region fallthrough
CT: control target
= control target key end

     0   :  { %12 = vsyncpa [#allocation3], 0  ;;  %s1515_s0 = inlined_call_operand.hbm [shape: f32[64,72], index: 0, kind: input, shape index: {}]   ;;  %s1516_s1 = inlined_call_operand.hbm [shape: bf16[72,128], index: 1, kind: input, shape index: {}]   ;;  %s1517_s2 = inlined_call_operand.vmem [shape: f32[1,128], index: 2, kind: input, shape index: {}]   ;;  %s1518_s3 = inlined_call_operand.hbm [shape: bf16[128,256], index: 3, kind: input, shape index: {}]   ;;  %s1519_s4 = inlined_call_operand.vmem [shape: f32[1,256], index: 4, kind: input, shape index: {}]   ;;  %s1520_s5 = inlined_call_operand.hbm [shape: bf16[256,128], index: 5, kind: input, shape index: {}]   ;;  %s1521_s6 = inlined_call_operand.vmem [shape: f32[1,128], index: 6, kind: input, shape index: {}]   ;;  %s1522_s7 = inlined_call_operand.vmem [shape: f32[64,4], index: 7, kind: output, shape index: {}]  }
   0x1   :  { %14 = vsyncpa [#allocation3 + $0x1], 0 }
   0x2   :  { %15 = vsyncpa [#allocation5], 0 }
   0x3   :  { %16 = vsyncpa [#allocation8], 0  ;;  %s1364_s24 = smov 0   ;;  %s1366_s25 = smov 0  }
   0x4   :  { %s1368_s26 = smov 0   ;;  %s1370_s27 = smov 0  }
   0x5 LB: > { %s1523_s28 = sadd.s32 4294967295, %s1315_s27   ;;  %p42_p0 = scmp.ne.s32.totalorder %s1307_s25, %s1303_s24  ;;  %s1315_s27 = sphi %s1370_s27, %s1533_s27   ;;  %s1311_s26 = sphi %s1368_s26, %s1532_s26   ;;  %s1307_s25 = sphi %s1366_s25, %s1531_s25   ;;  %s1303_s24 = sphi %s1364_s24, %s1530_s24  }
   0x6   : > { %p1386_p1 = scmp.eq.s32.totalorder %s1523_s28, 0  ;;  %p869_p2 = scmp.ge.s32.totalorder %s1315_s27, 1 }
   0x7   : > { %p205_p3 = scmp.lt.s32.totalorder %s1315_s27, 3  ;;  %s216_s10 = sshll.u32 %s1516_s1, 4  ;;  %s217_s10 = int_to_ptr.hbm [resolvable:$true] %s216_s10 }
   0x8   : > { %p1394_p4 = por %p1386_p1, %p42_p0  ;;  %s1317_s12 = smov [#allocation4]  }
   0x9   : > { %p1401_p5 = pnand %p869_p2, %p205_p3  ;;  %s218_s13 = sshll.u32 %s1317_s12, 4  ;;  %s219_s13 = int_to_ptr.vmem [resolvable:$true] %s218_s13 }
   0xa   : > { %s233_s17 = sshll.u32 %s1518_s3, 4  ;;  %s1318_s18 = smov 64   ;;  %s234_s17 = int_to_ptr.hbm [resolvable:$true] %s233_s17 }
   0xb   : > { %p1091_p6 = pneg %p1401_p5  ;;  %s1319_s19 = smov 4  }
   0xc   : > { %s1320_s20 = smov [#allocation6]   ;;  %s1321_s22 = smov 128  }
   0xd   : > { %p1409_p7 = pnand %p1091_p6, %p1386_p1  ;;  %s235_s21 = sshll.u32 %s1320_s20, 4  ;;  %s236_s21 = int_to_ptr.vmem [resolvable:$true] %s235_s21 }
   0xe   : > { %s1322_s23 = smov 8   ;;  %s250_s9 = sshll.u32 %s1520_s5, 4  ;;  %s251_s9 = int_to_ptr.hbm [resolvable:$true] %s250_s9 }
   0xf   : > { %1094 = dma.hbm_to_vmem [thread:$0]  (!%p1409_p7), %s217_s10, 576, %s219_s13, [#allocation5], %s1318_s18, %s1318_s18, %s1319_s19  }
  0x10   : > { %1097 = dma.hbm_to_vmem [thread:$0]  (!%p1409_p7), %s234_s17, 2048, %s236_s21, [#allocation5], %s1321_s22, %s1321_s22, %s1322_s23  }
  0x11   : > { %s1323_s10 = smov [#allocation7]   ;;  %s1429_s13 = sadd.s32 1, %s1315_s27  }
  0x12   : > { %s252_s12 = sshll.u32 %s1323_s10, 4  ;;  %s26_s15 = ssub.s32 %s1315_s27, %s1429_s13  ;;  %s253_s12 = int_to_ptr.vmem [resolvable:$true] %s252_s12 }
  0x13   : > { %1100 = dma.hbm_to_vmem [thread:$0]  (!%p1409_p7), %s251_s9, 2048, %s253_s12, [#allocation8], %s1318_s18, %s1318_s18, %s1319_s19  }
  0x14   : > { %s29_s16 = sadd.s32 1, %s1311_s26  ;;  %p27_p8 = scmp.eq.s32.totalorder %s26_s15, 0 }
  0x15   : > { %p36_p9 = scmp.ne.s32.totalorder %s1311_s26, %s1307_s25  ;;  %p37_p10 = scmp.eq.s32.totalorder %s1315_s27, 0 }
  0x16   : > { %p1108_p11 = scmp.lt.s32.totalorder %s1315_s27, 2  ;;  %s269_s20 = sand.u32 1, %s1311_s26  }
  0x17   : > { %s1439_s17 = scalar_select %p27_p8, %s1311_s26, %s29_s16  }
  0x18   : > { %p38_p12 = por %p37_p10, %p36_p9  ;;  %s874_s21 = sshll.u32 %s269_s20, 5 }
  0x19   : > { %s1032_s24 = sshll.u32 %s1315_s27, 5  ;;  %s273_s18 = scalar_lea.vmem [#allocation2], %s874_s21 }
  0x1a   : > { %s278_s14 = scalar_lea.hbm %s1515_s0, %s1032_s24  ;;  %s281_s19 = sshll.u32 %s273_s18, 4  ;;  %s282_s19 = int_to_ptr.vmem [resolvable:$true] %s281_s19 }
  0x1b   : > { %s279_s9 = sshll.u32 %s278_s14, 4  ;;  %p1446_p13 = pnand %p1108_p11, %p38_p12  ;;  %s280_s9 = int_to_ptr.hbm [resolvable:$true] %s279_s9 }
  0x1c   : > { %s270_s15 = scalar_lea.sflag [#allocation3], %s269_s20  ;;  %s1243_s16 = sshra.s32 %s280_s9, 4  ;;  %s1244_s16 = int_to_ptr.hbm [resolvable:$true] %s1243_s16 }
  0x1d   : > { %s1245_s28 = scalar_lea.hbm %s1244_s16, 32  ;;  %p1247_p2 = pneg %p1446_p13 }
  0x1e   : > { %p1246_p0 = scmp.ne.s32.totalorder %s1244_s16, %s1245_s28  ;;  %s1250_s8 = scalar_lea.hbm %s1515_s0, 64 }
  0x1f   : > { %p1251_p7 = scmp.lt.s32.totalorder %s1244_s16, %s1515_s0  ;;  %p1252_p8 = scmp.lt.s32.totalorder %s1250_s8, %s1245_s28 }
  0x20   : > { %p1248_p3 = pnand %p1247_p2, %p1246_p0 }
  0x21   : > { %p1253_p9 = por %p1252_p8, %p1251_p7 }
  0x22   : > { %p1249_p6 = pneg %p1248_p3 }
  0x24   : > { %p1254_p10 = pnand %p1253_p9, %p1249_p6 }
  0x26   : > { %1257 = shalt.err (!%p1254_p10)
}
  0x27   : > { %1104 = dma.hbm_to_vmem [thread:$0]  (!%p1446_p13), %s280_s9, 512, %s282_s19, %s270_s15, %s1321_s22, %s1321_s22, %s1322_s23  }
  0x28   : > { %293 = sbr.rel (%p1401_p5) target bundleno = 517 (0x205), region = 48  ;;  %s295_s20 = sand.u32 (!%p1401_p5), 1, %s1307_s25  }
  0x29   : > { %s878_s18 = sshll.u32 (!%p1401_p5), %s295_s20, 5  ;;  %s296_s24 = scalar_lea.sflag (!%p1401_p5), [#allocation3], %s295_s20 }
  0x2a   : > { %s1466_s21 = scalar_lea.vmem (!%p1401_p5), [#allocation2], %s878_s18 }
  0x2d   : > { %1290 = dma.done.wait (%p1394_p4), %s296_s24, 512  }
  0x2e   : > { %1292 = vsyncadd (%p1394_p4), %s296_s24, 4294966784 }
  0x2f   : > { %1294 = dma.done.wait (%p1386_p1), [#allocation5], 2624  }
  0x30   : > { %1296 = vsyncadd (%p1386_p1), [#allocation5], 4294964672 }
  0x31   : > { %1298 = dma.done.wait (%p1386_p1), [#allocation8], 2048  }
  0x32   : > { %1300 = vsyncadd (%p1386_p1), [#allocation8], 4294965248  ;;  %v368_v0 = vld [vmem:[#allocation4 + $0x20] sm:$0xf]  ;;  %vm407_vm0 = vcmask 1043456   ;;  %v1036_v4 = vld [vmem:[#allocation4 + $0x18] sm:$0xff] }
  0x33   : > { %v390_v1 = vunpack.c.l.b16 %v368_v0  ;;  %v1035_v5 = vld [vmem:[#allocation4 + $0x10] sm:$0xff]  ;;  %v1052_v7 = vld [vmem:[#allocation6 + $0x74] sm:$0xf0]  ;;  %v1051_v8 = vld [vmem:[#allocation6 + $0x74] sm:$0xf]  ;;  %vm400_vm1 = vcmask 588800  }
  0x34   : > { %v960_v6 = vld [vmem:[#allocation6 + $0x70] sm:$0xf]  ;;  %v962_v10 = vld [vmem:[#allocation6 + $0x78] sm:$0xf0]  ;;  %v952_v11 = vld [vmem:[#allocation6 + $0x60] sm:$0xf] }
  0x35   : > { %v395_v2 = vpack.c.b16 %v390_v1, %v390_v1  ;;  %v961_v9 = vor.u32 %v1052_v7, %v960_v6  ;;  %v1050_v12 = vld [vmem:[#allocation6 + $0x64] sm:$0xf0]  ;;  %v965_v13 = vor.u32 %v1051_v8, %v962_v10  ;;  %v1049_v14 = vld [vmem:[#allocation6 + $0x64] sm:$0xf]  ;;  %v954_v15 = vld [vmem:[#allocation6 + $0x68] sm:$0xf0] }
  0x36   : > { %v953_v16 = vor.u32 %v1050_v12, %v952_v11  ;;  %v957_v17 = vor.u32 %v1049_v14, %v954_v15  ;;  %v944_v18 = vld [vmem:[#allocation6 + $0x50] sm:$0xf]  ;;  %v1048_v19 = vld [vmem:[#allocation6 + $0x54] sm:$0xf0]  ;;  %v1034_v20 = vld [vmem:[#allocation4 + $0x8] sm:$0xff]  ;;  %s1529_s22 = sadd.s32 4294967295, %s1315_s27  }
  0x37   : > { %v409_v3 = vsel %vm407_vm0, %v395_v2, 0  ;;  %546 = vmatpush.bf16.msra.mxu1 %v961_v9  ;;  %565 = vmatpush.bf16.msra.mxu2 %v965_v13  ;;  %v1047_v21 = vld [vmem:[#allocation6 + $0x54] sm:$0xf]  ;;  %v946_v22 = vld [vmem:[#allocation6 + $0x58] sm:$0xf0]  ;;  %v945_v24 = vor.u32 %v1048_v19, %v944_v18  ;;  %v355_v29 = vld [vmem:[%s1466_s21 + $0x8] sm:$0xff] }
  0x38   : > { %414 = vmatpush.bf16.msra.mxu0 %v409_v3  ;;  %v1033_v23 = vld [vmem:[#allocation4] sm:$0xff]  ;;  %v949_v26 = vor.u32 %v1047_v21, %v946_v22  ;;  %v1046_v28 = vld [vmem:[#allocation6 + $0x44] sm:$0xf0]  ;;  %v1045_v30 = vld [vmem:[#allocation6 + $0x44] sm:$0xf]  ;;  %s882_s23 = sshll.u32 %s1529_s22, 2 }
  0x39   : > { %v354_v25 = vld [vmem:[%s1466_s21] sm:$0xff]  ;;  %v938_v31 = vld [vmem:[#allocation6 + $0x48] sm:$0xf0]  ;;  %v357_v36 = vld [vmem:[%s1466_s21 + $0x18] sm:$0xff]  ;;  %p348_p1 = scmp.lt.s32.totalorder %s882_s23, 7  ;;  %vm766_vm6 = vcmask 31744  }
  0x3a   : > { %v936_v27 = vld [vmem:[#allocation6 + $0x40] sm:$0xf]  ;;  %v358_v33 = vpack.c.bf16 %v355_v29, %v354_v25  ;;  %v941_v34 = vor.u32 %v1045_v30, %v938_v31  ;;  %v356_v35 = vld [vmem:[%s1466_s21 + $0x10] sm:$0xff]  ;;  %v1044_v39 = vld [vmem:[#allocation6 + $0x34] sm:$0xf0] }
  0x3b   : > { %547 = vmatpush.bf16.msra.mxu1 %v953_v16  ;;  %566 = vmatpush.bf16.msra.mxu2 %v957_v17  ;;  %v937_v32 = vor.u32 %v1046_v28, %v936_v27  ;;  %v359_v37 = vpack.c.bf16 %v357_v36, %v356_v35  ;;  %v928_v38 = vld [vmem:[#allocation6 + $0x30] sm:$0xf]  ;;  %v1043_v40 = vld [vmem:[#allocation6 + $0x34] sm:$0xf]  ;;  %v930_v42 = vld [vmem:[#allocation6 + $0x38] sm:$0xf0] }
  0x3c   : > { %415 = vmatpush.bf16.msra.mxu0 %v1036_v4  ;;  %v929_v41 = vor.u32 %v1044_v39, %v928_v38  ;;  %v933_v43 = vor.u32 %v1043_v40, %v930_v42  ;;  %v920_v44 = vld [vmem:[#allocation6 + $0x20] sm:$0xf]  ;;  %v1042_v45 = vld [vmem:[#allocation6 + $0x24] sm:$0xf0]  ;;  %v1041_v46 = vld [vmem:[#allocation6 + $0x24] sm:$0xf] }
  0x3d   : > { %v921_v47 = vor.u32 %v1042_v45, %v920_v44  ;;  %v922_v48 = vld [vmem:[#allocation6 + $0x28] sm:$0xf0]  ;;  %v912_v50 = vld [vmem:[#allocation6 + $0x10] sm:$0xf]  ;;  %v1040_v51 = vld [vmem:[#allocation6 + $0x14] sm:$0xf0] }
  0x3e   : > { %v925_v49 = vor.u32 %v1041_v46, %v922_v48  ;;  %v1039_v52 = vld [vmem:[#allocation6 + $0x14] sm:$0xf]  ;;  %v913_v53 = vor.u32 %v1040_v51, %v912_v50  ;;  %v914_v54 = vld [vmem:[#allocation6 + $0x18] sm:$0xf0]  ;;  %v904_v56 = vld [vmem:[#allocation6] sm:$0xf] }
  0x3f   : > { %548 = vmatpush.bf16.msra.mxu1 %v945_v24  ;;  %567 = vmatpush.bf16.msra.mxu2 %v949_v26  ;;  %v917_v55 = vor.u32 %v1039_v52, %v914_v54  ;;  %v1038_v57 = vld [vmem:[#allocation6 + $0x4] sm:$0xf0]  ;;  %v1037_v58 = vld [vmem:[#allocation6 + $0x4] sm:$0xf]  ;;  %v906_v60 = vld [vmem:[#allocation6 + $0x8] sm:$0xf0] }
  0x40   : > { %416 = vmatpush.bf16.msra.mxu0 %v1035_v5  ;;  %v905_v59 = vor.u32 %v1038_v57, %v904_v56  ;;  %v909_v61 = vor.u32 %v1037_v58, %v906_v60  ;;  %v1060_v63 = vld [vmem:[#allocation7 + $0x38] sm:$0xff]  ;;  %v1059_v2 = vld [vmem:[#allocation7 + $0x30] sm:$0xff]  ;;  %v1058_v5 = vld [vmem:[#allocation7 + $0x28] sm:$0xff]  ;;  %s1535_s23 = smov (!%p348_p1, %s882_s23), 7 }
  0x41   : > { %v1068_v0 = vld [vmem:[#allocation7 + $0x78] sm:$0xff]  ;;  %728 = vmatpush.bf16.msra.mxu3 %v1060_v63  ;;  %v1067_v3 = vld [vmem:[#allocation7 + $0x70] sm:$0xff]  ;;  %v1066_v6 = vld [vmem:[#allocation7 + $0x68] sm:$0xff]  ;;  %s883_s12 = sshll.u32 %s1535_s23, 3 }
  0x42   : > { %v1151_v1 = vld [vmem:[%s1517_s2] ss:$0 sm:$0xff]  ;;  %v1057_v10 = vld [vmem:[#allocation7 + $0x20] sm:$0xff]  ;;  %v1055_v26 = vld [vmem:[#allocation7 + $0x10] sm:$0xff]  ;;  %s351_s8 = scalar_lea.vmem %s1522_s7, %s883_s12 }
  0x43   : > { %549 = vmatpush.bf16.msra.mxu1 %v937_v32  ;;  %568 = vmatpush.bf16.msra.mxu2 %v941_v34  ;;  %v1056_v24 = vld [vmem:[#allocation7 + $0x18] sm:$0xff]  ;;  %v1065_v25 = vld [vmem:[#allocation7 + $0x60] sm:$0xff]  ;;  %v1054_v28 = vld [vmem:[#allocation7 + $0x8] sm:$0xff] }
  0x44   : > { %417 = vmatpush.bf16.msra.mxu0 %v1034_v20  ;;  %v1064_v27 = vld [vmem:[#allocation7 + $0x58] sm:$0xff]  ;;  %v1063_v29 = vld [vmem:[#allocation7 + $0x50] sm:$0xff]  ;;  %v1053_v30 = vld [vmem:[#allocation7] sm:$0xff] }
  0x45   : > { %729 = vmatpush.bf16.msra.mxu3 %v1059_v2  ;;  %v1062_v31 = vld [vmem:[#allocation7 + $0x48] sm:$0xff]  ;;  %v1061_v32 = vld [vmem:[#allocation7 + $0x40] sm:$0xff] }
  0x47   : > { %550 = vmatpush.bf16.msra.mxu1 %v929_v41  ;;  %569 = vmatpush.bf16.msra.mxu2 %v933_v43 }
  0x48   : > { %418 = vmatpush.bf16.msra.mxu0 %v1033_v23 }
  0x49   : > { %730 = vmatpush.bf16.msra.mxu3 %v1058_v5 }
  0x4b   : > { %900 = vmatmul.msk.bf16.vlgmr.msra.gmra.mxu0 %vm400_vm1, %v358_v33  ;;  %551 = vmatpush.bf16.msra.mxu1 %v921_v47  ;;  %v460_v33 = vld [vmem:[%s1519_s4] sm:$0x3] }
  0x4c   : > { %570 = vmatpush.bf16.msra.mxu2 %v925_v49  ;;  %747 = vmatpush.bf16.msrb.mxu0 %v1068_v0  ;;  %v462_v35 = vperm.slane %v460_v33, 0  ;;  %v463_v39 = vperm.slane %v460_v33, 1 }
  0x4d   : > { %731 = vmatpush.bf16.msra.mxu3 %v1057_v10 }
  0x4f   : > { %552 = vmatpush.bf16.msra.mxu1 %v913_v53 }
  0x50   : > { %571 = vmatpush.bf16.msra.mxu2 %v917_v55  ;;  %748 = vmatpush.bf16.msrb.mxu0 %v1067_v3 }
  0x51   : > { %732 = vmatpush.bf16.msra.mxu3 %v1056_v24 }
  0x53   : > { %553 = vmatpush.bf16.msra.mxu1 %v905_v59 }
  0x54   : > { %572 = vmatpush.bf16.msra.mxu2 %v909_v61  ;;  %749 = vmatpush.bf16.msrb.mxu0 %v1066_v6 }
  0x55   : > { %733 = vmatpush.bf16.msra.mxu3 %v1055_v26 }
  0x57   : > { %1069 = vmatpush.bf16.msrb.mxu1 %v1068_v0  ;;  %v1152_v0 = vld [vmem:[%s1521_s6] ss:$0 sm:$0xff] }
  0x58   : > { %750 = vmatpush.bf16.msrb.mxu0 %v1065_v25 }
  0x59   : > { %734 = vmatpush.bf16.msra.mxu3 %v1054_v28 }
  0x5b   : > { %901 = vmatmul.msk.bf16.gmra.mxu0 %vm400_vm1, %v359_v37  ;;  %1070 = vmatpush.bf16.msrb.mxu1 %v1067_v3 }
  0x5c   : > { %751 = vmatpush.bf16.msrb.mxu0 %v1064_v27 }
  0x5d   : > { %735 = vmatpush.bf16.msra.mxu3 %v1053_v30 }
  0x5f   : > { %1071 = vmatpush.bf16.msrb.mxu1 %v1066_v6 }
  0x60   : > { %752 = vmatpush.bf16.msrb.mxu0 %v1063_v29 }
  0x63   : > { %1072 = vmatpush.bf16.msrb.mxu1 %v1065_v25 }
  0x64   : > { %753 = vmatpush.bf16.msrb.mxu0 %v1062_v31 }
  0x67   : > { %1073 = vmatpush.bf16.msrb.mxu1 %v1064_v27 }
  0x68   : > { %754 = vmatpush.bf16.msrb.mxu0 %v1061_v32 }
  0x6b   : > { %1074 = vmatpush.bf16.msrb.mxu1 %v1063_v29 }
  0x6f   : > { %1075 = vmatpush.bf16.msrb.mxu1 %v1062_v31 }
  0x73   : > { %1076 = vmatpush.bf16.msrb.mxu1 %v1061_v32 }
  0xc8   : > { %v420_v62 = vpop.f32.mrf.mxu0 }
  0xc9   : > { %v421_v4 = vadd.f32 %v1151_v1, %v420_v62 }
  0xcb   : > { %v434_v8 = vmul.f32 0.01, %v421_v4  ;;  %vm430_vm2 = vcmp.gt.f32.partialorder %v421_v4, 0.0 }
  0xcd   : > { %v438_v12 = vsel %vm430_vm2, %v421_v4, %v434_v8 }
  0xd0   : > { %v422_v7 = vpop.f32.mrf.mxu0 }
  0xd1   : > { %v423_v9 = vadd.f32 %v1151_v1, %v422_v7 }
  0xd3   : > { %v435_v11 = vmul.f32 0.01, %v423_v9  ;;  %vm431_vm3 = vcmp.gt.f32.partialorder %v423_v9, 0.0 }
  0xd5   : > { %v439_v13 = vsel %vm431_vm3, %v423_v9, %v435_v11 }
  0xd6   : > { %v442_v14 = vpack.c.bf16 %v439_v13, %v438_v12 }
  0xd8   : > { %v425_v15 = vpop.f32.mrf.mxu0  ;;  %554 = vmatmul.bf16.vlgmr.msra.gmra.mxu1 %v442_v14  ;;  %573 = vmatmul.bf16.vlgmr.msra.gmra.mxu2 %v442_v14 }
  0xd9   : > { %v426_v16 = vadd.f32 %v1151_v1, %v425_v15 }
  0xdb   : > { %v436_v18 = vmul.f32 0.01, %v426_v16  ;;  %vm432_vm4 = vcmp.gt.f32.partialorder %v426_v16, 0.0 }
  0xdd   : > { %v440_v21 = vsel %vm432_vm4, %v426_v16, %v436_v18 }
  0xe0   : > { %v427_v17 = vpop.f32.mrf.mxu0 }
  0xe1   : > { %v428_v19 = vadd.f32 %v1151_v1, %v427_v17 }
  0xe3   : > { %v437_v20 = vmul.f32 0.01, %v428_v19  ;;  %vm433_vm5 = vcmp.gt.f32.partialorder %v428_v19, 0.0 }
  0xe5   : > { %v441_v22 = vsel %vm433_vm5, %v428_v19, %v437_v20 }
  0xe6   : > { %v443_v23 = vpack.c.bf16 %v441_v22, %v440_v21 }
  0xe8   : > { %559 = vmatmul.bf16.gmra.mxu1 %v443_v23  ;;  %578 = vmatmul.bf16.gmra.mxu2 %v443_v23 }
 0x155   : > { %v555_v34 = vpop.f32.mrf.mxu1 }
 0x156   : > { %v556_v37 = vadd.f32 %v555_v34, %v462_v35 }
 0x158   : > { %v584_v41 = vmax.f32 %v556_v37, 0.0 }
 0x15b   : > { %v574_v36 = vpop.f32.mrf.mxu2 }
 0x15c   : > { %v575_v43 = vadd.f32 %v574_v36, %v463_v39 }
 0x15d   : > { %v557_v38 = vpop.f32.mrf.mxu1 }
 0x15e   : > { %v558_v40 = vadd.f32 %v557_v38, %v462_v35  ;;  %v585_v48 = vmax.f32 %v575_v43, 0.0 }
 0x160   : > { %v586_v42 = vmax.f32 %v558_v40, 0.0 }
 0x162   : > { %v592_v44 = vpack.c.bf16 %v586_v42, %v584_v41 }
 0x163   : > { %v576_v45 = vpop.f32.mrf.mxu2 }
 0x164   : > { %v577_v46 = vadd.f32 %v576_v45, %v463_v39  ;;  %736 = vmatmul.bf16.vlgmr.msra.gmra.mxu3 %v592_v44 }
 0x165   : > { %v560_v47 = vpop.f32.mrf.mxu1 }
 0x166   : > { %v587_v49 = vmax.f32 %v577_v46, 0.0  ;;  %v561_v52 = vadd.f32 %v560_v47, %v462_v35 }
 0x168   : > { %v593_v50 = vpack.c.bf16 %v587_v49, %v585_v48  ;;  %v588_v55 = vmax.f32 %v561_v52, 0.0 }
 0x16a   : > { %755 = vmatmul.bf16.vlgmr.msrb.gmra.mxu0 %v593_v50 }
 0x16b   : > { %v579_v51 = vpop.f32.mrf.mxu2 }
 0x16c   : > { %v580_v57 = vadd.f32 %v579_v51, %v463_v39 }
 0x16d   : > { %v562_v53 = vpop.f32.mrf.mxu1 }
 0x16e   : > { %v563_v54 = vadd.f32 %v562_v53, %v462_v35  ;;  %v589_v61 = vmax.f32 %v580_v57, 0.0 }
 0x170   : > { %v590_v56 = vmax.f32 %v563_v54, 0.0 }
 0x172   : > { %v594_v58 = vpack.c.bf16 %v590_v56, %v588_v55 }
 0x173   : > { %v581_v59 = vpop.f32.mrf.mxu2 }
 0x174   : > { %v582_v60 = vadd.f32 %v581_v59, %v463_v39  ;;  %741 = vmatmul.bf16.gmra.mxu3 %v594_v58 }
 0x176   : > { %v591_v62 = vmax.f32 %v582_v60, 0.0 }
 0x178   : > { %v595_v63 = vpack.c.bf16 %v591_v62, %v589_v61 }
 0x17a   : > { %760 = vmatmul.bf16.vlgmr.msrb.gmra.mxu1 %v595_v63 }
 0x1e7   : > { %v737_v1 = vpop.f32.mrf.mxu3  ;;  %v756_v2 = vpop.f32.mrf.mxu0 }
 0x1e8   : > { %v738_v3 = vadd.f32 %v1152_v0, %v737_v1 }
 0x1ea   : > { %v757_v4 = vadd.f32 %v756_v2, %v738_v3 }
 0x1ec   : > { %767 = vst.msk [vmem:[%s351_s8] sm:$0xff] %vm766_vm6, %v757_v4 }
 0x1ef   : > { %v739_v5 = vpop.f32.mrf.mxu3  ;;  %v758_v7 = vpop.f32.mrf.mxu0 }
 0x1f0   : > { %v740_v6 = vadd.f32 %v1152_v0, %v739_v5 }
 0x1f2   : > { %v759_v8 = vadd.f32 %v758_v7, %v740_v6 }
 0x1f4   : > { %768 = vst.msk [vmem:[%s351_s8 + $0x8] sm:$0xff] %vm766_vm6, %v759_v8 }
 0x1f7   : > { %v742_v9 = vpop.f32.mrf.mxu3  ;;  %v761_v10 = vpop.f32.mrf.mxu1 }
 0x1f8   : > { %v743_v11 = vadd.f32 %v1152_v0, %v742_v9 }
 0x1fa   : > { %v762_v12 = vadd.f32 %v761_v10, %v743_v11 }
 0x1fc   : > { %769 = vst.msk [vmem:[%s351_s8 + $0x10] sm:$0xff] %vm766_vm6, %v762_v12 }
 0x1ff   : > { %v744_v13 = vpop.f32.mrf.mxu3  ;;  %v763_v15 = vpop.f32.mrf.mxu1 }
 0x200   : > { %v745_v14 = vadd.f32 %v1152_v0, %v744_v13 }
 0x202   : > { %v764_v16 = vadd.f32 %v763_v15, %v745_v14 }
 0x204   : > { %770 = vst.msk [vmem:[%s351_s8 + $0x18] sm:$0xff] %vm766_vm6, %v764_v16 }
 0x205 PF: > { %p19_p4 = scmp.ge.s32.totalorder %s1429_s13, 4   ;;  %s1530_s24 = smov %s1307_s25 }
 0x206   : > { %s1531_s25 = smov %s1311_s26  ;;  %s1532_s26 = smov %s1439_s17 }
 0x207   : > { %s1533_s27 = smov %s1429_s13  ;;  %21 = sbr.rel (!%p19_p4) target bundleno = 5 (0x5), region = 100 }
 0x20c   :  { %793 = vsyncpa [#allocation3], 1 }
 0x20d   :  { %795 = vsyncpa [#allocation3 + $0x1], 1 }
 0x20e   :  { %796 = vsyncpa [#allocation5], 1 }
 0x20f   :  { %797 = vsyncpa [#allocation8], 1 }

</bundles_post_ra>
